<compile_context>
chip_gen: v5e
topology: v5e:2x2
jax: 0.10.0
libtpu: 0.0.40
codegen_flags: <defaults>
</compile_context>

<pallas_src>
import jax
import jax.numpy as jnp
from jax.experimental import pallas as pl
from jax.experimental.pallas import tpu as pltpu


def _round_up(a, b):
    return ((a + b - 1) // b) * b


def _sublane_multiple(dtype):
    # f32/i32 -> 8, bf16/f16 -> 16, int8/fp8 -> 32 (sub-32-bit packs sublanes).
    return max(8, 32 // jnp.dtype(dtype).itemsize)


def _aconc_kernel(x_ref, hdp_ref, hbdp_ref, p2h_ref, o_ref):
    # x tile: (TR, TL); params: (TR, 1), broadcast across lanes.
    x = x_ref[...].astype(jnp.float32)
    t = jnp.tanh(hbdp_ref[...] * x)                      # single EUP op / elem
    o_ref[...] = (x * (hdp_ref[...] * t + p2h_ref[...])).astype(o_ref.dtype)


def aconc_pallas(x, p1, p2, beta, *, target_tile_bytes=2 * 1024 * 1024,
                 max_tl=1024):
    """x: (N, C, H, W); p1/p2/beta: (1, C, 1, 1). Returns (N, C, H, W)."""
    N, C, H, W = x.shape
    R, L = N * C, H * W
    out_dtype = x.dtype
    itemsize = jnp.dtype(x.dtype).itemsize
    sub = _sublane_multiple(x.dtype)

    # ---- hoisted per-channel parameter algebra (f32) ----
    dp = (p1 - p2).astype(jnp.float32).reshape(C, 1)
    half_dp = 0.5 * dp                                         # 0.5*(p1-p2)
    half_bdp = 0.5 * beta.astype(jnp.float32).reshape(C, 1) * dp
    p2h = p2.astype(jnp.float32).reshape(C, 1) + half_dp       # p2 + 0.5*dp

    # Tile per-channel params across the batch: row r = n*C + c.
    half_dp_r = jnp.tile(half_dp, (N, 1))    # (R, 1)
    half_bdp_r = jnp.tile(half_bdp, (N, 1))  # (R, 1)
    p2h_r = jnp.tile(p2h, (N, 1))            # (R, 1)

    x2 = x.reshape(R, L)

    # ---- tile-size selection (no padding; Pallas handles edge blocks) ----
    # Lane tile: full spatial extent when it fits, else a multiple of 128.
    TL = L if L <= max_tl else max_tl
    # Row tile: aim for ~target_tile_bytes per x tile, rounded to the
    # dtype's sublane packing (or the full row extent).
    tr_target = max(sub, target_tile_bytes // max(TL * itemsize, 1))
    if tr_target >= R:
        TR = R
    else:
        TR = max(sub, (tr_target // sub) * sub)

    grid_r = pl.cdiv(R, TR)
    grid_l = pl.cdiv(L, TL)

    # v7x megacore: avoid a degenerate 1x1 grid when there is enough work.
    if grid_r * grid_l == 1:
        if L >= 2 * 128:
            TL = _round_up(pl.cdiv(L, 2), 128)
            grid_l = pl.cdiv(L, TL)
        elif R >= 2 * sub:
            TR = _round_up(pl.cdiv(R, 2), sub)
            grid_r = pl.cdiv(R, TR)

    grid = (grid_r, grid_l)   # lane axis innermost -> param blocks not re-DMA'd

    out2 = pl.pallas_call(
        _aconc_kernel,
        out_shape=jax.ShapeDtypeStruct((R, L), out_dtype),
        grid_spec=pl.GridSpec(
            grid=grid,
            in_specs=[
                pl.BlockSpec((TR, TL), lambda i, j: (i, j)),   # x tile
                pl.BlockSpec((TR, 1), lambda i, j: (i, 0)),    # 0.5*(p1-p2)
                pl.BlockSpec((TR, 1), lambda i, j: (i, 0)),    # 0.5*beta*(p1-p2)
                pl.BlockSpec((TR, 1), lambda i, j: (i, 0)),    # p2 + 0.5*(p1-p2)
            ],
            out_specs=pl.BlockSpec((TR, TL), lambda i, j: (i, j)),
        ),
        compiler_params=pltpu.CompilerParams(
            dimension_semantics=("parallel", "parallel"),
        ),
    )(x2, half_dp_r, half_bdp_r, p2h_r)

    return out2.reshape(N, C, H, W)


def aconc_ref(x, p1, p2, beta):
    """Pure-JAX reference matching the PyTorch forward exactly."""
    dpx = (p1 - p2) * x
    return dpx * jax.nn.sigmoid(beta * dpx) + p2 * x


if __name__ == "__main__":
    key = jax.random.PRNGKey(0)
    k_x, k_p1, k_p2, k_x2, k_x3 = jax.random.split(key, 5)

    # Parameters per AconC.__init__: randn for p1/p2, ones for beta.
    N, C = 2, 4
    p1 = jax.random.normal(k_p1, (1, C, 1, 1), dtype=jnp.float32)
    p2 = jax.random.normal(k_p2, (1, C, 1, 1), dtype=jnp.float32)
    beta = jnp.ones((1, C, 1, 1), dtype=jnp.float32)

    # --- Case 1: 16x16 spatial (lane count a multiple of 128) ---
    H, W = 16, 16
    x = jax.random.normal(k_x, (N, C, H, W), dtype=jnp.float32)
    out = jax.block_until_ready(aconc_pallas(x, p1, p2, beta))
    ref = aconc_ref(x, p1, p2, beta)
    assert out.shape == (N, C, H, W)
    assert jnp.allclose(out, ref, atol=1e-4, rtol=1e-5), "mismatch (16x16)"

    # --- Case 2: ragged spatial size (7x7): partial-lane edge block path ---
    H2, W2 = 7, 7
    x_r = jax.random.normal(k_x2, (N, C, H2, W2), dtype=jnp.float32)
    out_r = jax.block_until_ready(aconc_pallas(x_r, p1, p2, beta))
    ref_r = aconc_ref(x_r, p1, p2, beta)
    assert out_r.shape == (N, C, H2, W2)
    assert jnp.allclose(out_r, ref_r, atol=1e-4, rtol=1e-5), "mismatch (7x7)"

    # --- Case 3: more channels, 14x14 spatial: exercises the row-split grid ---
    C3, H3, W3 = 8, 14, 14
    p1_3 = jax.random.normal(k_p1, (1, C3, 1, 1), dtype=jnp.float32)
    p2_3 = jax.random.normal(k_p2, (1, C3, 1, 1), dtype=jnp.float32)
    beta_3 = jnp.ones((1, C3, 1, 1), dtype=jnp.float32)
    x_3 = jax.random.normal(k_x3, (N, C3, H3, W3), dtype=jnp.float32)
    out_3 = jax.block_until_ready(aconc_pallas(x_3, p1_3, p2_3, beta_3))
    ref_3 = aconc_ref(x_3, p1_3, p2_3, beta_3)
    assert out_3.shape == (N, C3, H3, W3)
    assert jnp.allclose(out_3, ref_3, atol=1e-4, rtol=1e-5), "mismatch (14x14)"

    print("KERNEL_OK")
</pallas_src>

<mosaic_0001>
module attributes {stable_mosaic.version = 11 : i64} {
  func.func @_aconc_kernel(%arg0: i32, %arg1: i32, %arg2: memref<8x128xf32, #tpu.memory_space<vmem>>, %arg3: memref<8x1xf32, #tpu.memory_space<vmem>>, %arg4: memref<8x1xf32, #tpu.memory_space<vmem>>, %arg5: memref<8x1xf32, #tpu.memory_space<vmem>>, %arg6: memref<8x128xf32, #tpu.memory_space<vmem>>) attributes {dimension_semantics = [#tpu.dimension_semantics<parallel>, #tpu.dimension_semantics<parallel>], iteration_bounds = array<i64: 1, 2>, scalar_prefetch = 0 : i64, scratch_operands = 0 : i64, tpu.core_type = #tpu.core_type<tc>, window_params = [{transform_indices = @transform_0, window_bounds = array<i64: 8, 128>}, {transform_indices = @transform_1, window_bounds = array<i64: 8, 1>}, {transform_indices = @transform_2, window_bounds = array<i64: 8, 1>}, {transform_indices = @transform_3, window_bounds = array<i64: 8, 1>}, {transform_indices = @transform_4, window_bounds = array<i64: 8, 128>}]} {
    %c0 = arith.constant 0 : index
    %c0_0 = arith.constant 0 : index
    %0 = vector.load %arg2[%c0, %c0_0] : memref<8x128xf32, #tpu.memory_space<vmem>>, vector<8x128xf32>
    %c0_1 = arith.constant 0 : index
    %c0_2 = arith.constant 0 : index
    %1 = vector.load %arg4[%c0_1, %c0_2] : memref<8x1xf32, #tpu.memory_space<vmem>>, vector<8x1xf32>
    %2 = vector.broadcast %1 : vector<8x1xf32> to vector<8x128xf32>
    %3 = arith.mulf %2, %0 : vector<8x128xf32>
    %4 = math.tanh %3 : vector<8x128xf32>
    %c0_3 = arith.constant 0 : index
    %c0_4 = arith.constant 0 : index
    %5 = vector.load %arg3[%c0_3, %c0_4] : memref<8x1xf32, #tpu.memory_space<vmem>>, vector<8x1xf32>
    %6 = vector.broadcast %5 : vector<8x1xf32> to vector<8x128xf32>
    %7 = arith.mulf %6, %4 : vector<8x128xf32>
    %c0_5 = arith.constant 0 : index
    %c0_6 = arith.constant 0 : index
    %8 = vector.load %arg5[%c0_5, %c0_6] : memref<8x1xf32, #tpu.memory_space<vmem>>, vector<8x1xf32>
    %9 = vector.broadcast %8 : vector<8x1xf32> to vector<8x128xf32>
    %10 = arith.addf %7, %9 : vector<8x128xf32>
    %11 = arith.mulf %0, %10 : vector<8x128xf32>
    %c0_7 = arith.constant 0 : index
    %c0_8 = arith.constant 0 : index
    %12 = vector.load %arg6[%c0_7, %c0_8] : memref<8x128xf32, #tpu.memory_space<vmem>>, vector<8x128xf32>
    tpu.vector_store %arg6[%c0_7, %c0_8], %11 {strides = array<i32>} : memref<8x128xf32, #tpu.memory_space<vmem>>, vector<8x128xf32>,
    return
  }
  func.func @transform_0(%arg0: i32, %arg1: i32) -> (i32, i32) {
    %c0_i32 = arith.constant 0 : i32
    return %arg0, %arg1 : i32, i32
  }
  func.func @transform_1(%arg0: i32, %arg1: i32) -> (i32, i32) {
    %c0_i32 = arith.constant 0 : i32
    %c0_i32_0 = arith.constant 0 : i32
    return %arg0, %c0_i32 : i32, i32
  }
  func.func @transform_2(%arg0: i32, %arg1: i32) -> (i32, i32) {
    %c0_i32 = arith.constant 0 : i32
    %c0_i32_0 = arith.constant 0 : i32
    return %arg0, %c0_i32 : i32, i32
  }
  func.func @transform_3(%arg0: i32, %arg1: i32) -> (i32, i32) {
    %c0_i32 = arith.constant 0 : i32
    %c0_i32_0 = arith.constant 0 : i32
    return %arg0, %c0_i32 : i32, i32
  }
  func.func @transform_4(%arg0: i32, %arg1: i32) -> (i32, i32) {
    %c0_i32 = arith.constant 0 : i32
    return %arg0, %arg1 : i32, i32
  }
}

</mosaic_0001>

<bundles_post_ra>
// kernel: tpu_custom_call.1
= control target key start
LH: loop header
LB: loop body
LE: loop exit
PB: predicated region body
PF: predicated region fallthrough
CT: control target
= control target key end

     0   :  { %9 = vsyncpa [#allocation3], 0  ;;  %s721_s0 = inlined_call_operand.vmem [shape: f32[8,256], index: 0, kind: input, shape index: {}]   ;;  %s722_s1 = inlined_call_operand.vmem [shape: f32[8,1], index: 1, kind: input, shape index: {}]   ;;  %s723_s2 = inlined_call_operand.vmem [shape: f32[8,1], index: 2, kind: input, shape index: {}]   ;;  %s724_s3 = inlined_call_operand.vmem [shape: f32[8,1], index: 3, kind: input, shape index: {}]   ;;  %s725_s4 = inlined_call_operand.hbm [shape: f32[8,256], index: 4, kind: output, shape index: {}]  }
   0x1   :  { %11 = vsyncpa [#allocation3 + $0x1], 0  ;;  %s615_s15 = smov 0   ;;  %s617_s16 = smov 0  }
   0x2   :  { %s619_s17 = smov 0   ;;  %s621_s18 = smov 0  }
   0x3   :  { %s623_s19 = smov 0   ;;  %s625_s20 = smov 0  }
   0x4 LB: > { %s435_s21 = sadd.s32 4294967295, %s587_s20   ;;  %s436_s22 = sadd.s32 4294967294, %s587_s20   ;;  %s587_s20 = sphi %s625_s20, %s17_s20   ;;  %s583_s19 = sphi %s623_s19, %s732_s19   ;;  %s579_s18 = sphi %s621_s18, %s731_s18   ;;  %s575_s17 = sphi %s619_s17, %s730_s17   ;;  %s571_s16 = sphi %s617_s16, %s729_s16   ;;  %s567_s15 = sphi %s615_s15, %s728_s15  }
   0x5   : > { %s26_s23 = sadd.s32 1, %s583_s19  ;;  %s144_s24 = sadd.s32 1, %s575_s17 }
   0x6   : > { %p27_p0 = scmp.ge.s32.totalorder %s26_s23, 2  ;;  %p154_p1 = scmp.ne.s32.totalorder %s575_s17, %s571_s16 }
   0x7   : > { %p155_p2 = scmp.eq.s32.totalorder %s435_s21, 1  ;;  %p160_p3 = scmp.ne.s32.totalorder %s571_s16, %s567_s15 }
   0x8   : > { %s734_s23 = smov (%p27_p0, %s26_s23), 0  ;;  %p161_p5 = scmp.eq.s32.totalorder %s436_s22, 1 }
   0x9   : > { %p655_p4 = por %p155_p2, %p154_p1  ;;  %s140_s26 = ssub.s32 %s583_s19, %s734_s23 }
   0xa   : > { %p442_p6 = scmp.ge.s32.totalorder %s587_s20, 1  ;;  %p142_p7 = scmp.eq.s32.totalorder %s140_s26, 0 }
   0xb   : > { %p662_p8 = por %p161_p5, %p160_p3  ;;  %p211_p9 = scmp.lt.s32.totalorder %s587_s20, 3 }
   0xc   : > { %s668_s28 = scalar_select %p142_p7, %s575_s17, %s144_s24  }
   0xd   : > { %p212_p10 = pnand %p442_p6, %p211_p9 }
   0xe   : > { %p254_p11 = scmp.lt.s32.totalorder (!%p212_p10), %s579_s18, 1  ;;  %s249_s14 = sand.u32 (!%p212_p10), 1, %s571_s16  }
   0xf   : > { %215 = sbr.rel (%p212_p10) target bundleno = 155 (0x9b), region = 36  ;;  %s443_s21 = sshll.u32 (!%p212_p10), %s249_s14, 3 }
  0x10   : > { %s446_s22 = sshll.u32 (!%p212_p10), %s579_s18, 3  ;;  %s251_s30 = scalar_lea.vmem (!%p212_p10), [#allocation2], %s443_s21 }
  0x11   : > { %s310_s29 = scalar_lea.hbm (!%p212_p10), %s725_s4, %s446_s22  ;;  %s312_s5 = sshll.u32 (!%p212_p10), %s251_s30, 4  ;;  %s313_s5 = int_to_ptr.vmem [resolvable:$true] %s312_s5 }
  0x12   : > { %s314_s6 = sshll.u32 (!%p212_p10), %s310_s29, 4  ;;  %s298_s7 = scalar_lea.sflag (!%p212_p10), [#allocation3], %s249_s14  ;;  %s315_s6 = int_to_ptr.hbm [resolvable:$true] %s314_s6 }
  0x13   : > { %s523_s8 = sshra.s32 (!%p212_p10), %s315_s6, 4  ;;  %s529_s11 = scalar_lea.hbm (!%p212_p10), %s725_s4, 16  ;;  %s524_s8 = int_to_ptr.hbm [resolvable:$true] %s523_s8 }
  0x14   : > { %v273_v0 = vld [vmem:[%s723_s2] sm:$0xff]  ;;  %v589_v2 = vmov 0   ;;  %s255_s9 = scalar_select %p254_p11, %s579_s18, 1 }
  0x15   : > { %v288_v1 = vld [vmem:[%s724_s3] sm:$0xff]  ;;  %505 = vset.pattern.permute.xlu0 %v589_v2  ;;  %506 = vset.pattern.permute.xlu1 %v589_v2  ;;  %s525_s18 = scalar_lea.hbm %s524_s8, 8  ;;  %p530_p1 = scmp.lt.s32.totalorder %s524_s8, %s725_s4 }
  0x16   : > { %276 = vperm.xlu0 %505, %v273_v0   ;;  %291 = vperm.xlu1 %506, %v288_v1   ;;  %v281_v3 = vld [vmem:[%s722_s1] sm:$0xff]  ;;  %s444_s10 = sshll.u32 %s255_s9, 3  ;;  %p526_p12 = scmp.ne.s32.totalorder %s524_s8, %s525_s18 }
  0x17   : > { %s259_s13 = scalar_lea.vmem %s721_s0, %s444_s10  ;;  %p531_p2 = scmp.lt.s32.totalorder %s529_s11, %s525_s18 }
  0x18   : > { %v272_v4 = vld [vmem:[%s259_s13] sm:$0xff]  ;;  %p527_p13 = pnand %p526_p12, %p655_p4 }
  0x19   : > { %p532_p3 = por %p531_p2, %p530_p1 }
  0x1a   : > { %p528_p0 = pneg %p527_p13 }
  0x1c   : > { %p533_p5 = pnand %p532_p3, %p528_p0 }
  0x1e   : > { %284 = vperm.xlu0 %505, %v281_v3  }
  0x88   : > { %v277_v5 = vpop.permute.xlu0 %276  ;;  %v292_v9 = vpop.permute.xlu1 %291 }
  0x89   : > { %v279_v6 = vmul.f32 %v277_v5, %v272_v4 }
  0x8b   : > { %507 = vtanh.f32 %v279_v6 }
  0x90   : > { %v285_v7 = vpop.permute.xlu0 %284 }
  0x91   : > { %v508_v8 = vpop.eup %507 }
  0x92   : > { %v287_v10 = vmul.f32 %v508_v8, %v285_v7 }
  0x94   : > { %v294_v11 = vadd.f32 %v292_v9, %v287_v10 }
  0x96   : > { %v295_v12 = vmul.f32 %v294_v11, %v272_v4 }
  0x98   : > { %296 = vst [vmem:[%s251_s30] sm:$0xff] %v295_v12 }
  0x99   : > { %536 = shalt.err (!%p533_p5)
}
  0x9a   : > { %449 = dma.vmem_to_hbm [thread:$0]  (%p655_p4), %s313_s5, 128, %s315_s6, %s298_s7  }
  0x9b PF: > { %p455_p6 = scmp.ge.s32.totalorder %s587_s20, 2  ;;  %s326_s14 = sand.u32 1, %s567_s15  }
  0x9c   : > { %s327_s21 = scalar_lea.sflag [#allocation3], %s326_s14 }
  0x9d   : > { %p452_p7 = pnand %p455_p6, %p662_p8 }
  0x9f   : > { %p453_p9 = pneg %p452_p7 }
  0xa1   : > { %562 = dma.done.wait (%p453_p9), %s327_s21, 128  }
  0xa2   : > { %564 = vsyncadd (%p453_p9), %s327_s21, 4294967168  ;;  %s17_s20 = sadd.s32 1, %s587_s20   ;;  %s728_s15 = smov %s571_s16 }
  0xa3   : > { %p14_p10 = scmp.ge.s32.totalorder %s17_s20, 4   ;;  %s729_s16 = smov %s575_s17 }
  0xa4   : > { %s730_s17 = smov %s668_s28  ;;  %s731_s18 = smov %s583_s19 }
  0xa5   : > { %s732_s19 = smov %s734_s23  ;;  %16 = sbr.rel (!%p14_p10) target bundleno = 4 (0x4), region = 80 }
  0xaa   :  { %333 = vsyncpa [#allocation3], 1 }
  0xab   :  { %335 = vsyncpa [#allocation3 + $0x1], 1 }

</bundles_post_ra>
